<compile_context>
chip_gen: v6e
topology: v6e:2x2x1
jax: 0.10.0
libtpu: 0.0.40
codegen_flags: <defaults>
</compile_context>

<pallas_src>
import functools

import jax
import jax.numpy as jnp
from jax.experimental import pallas as pl
from jax.experimental.pallas import tpu as pltpu

_MAX_TM = 256   # max batch rows per grid step
_LANE = 128     # lane width
_SUBLANE_BF16 = 16  # bf16 sublane packing granularity


def _round_up(x: int, m: int) -> int:
    return ((x + m - 1) // m) * m


def generator_kernel(x_ref, w1_ref, b1_ref, w2_ref, b2_ref, o_ref):
    # Hidden layer: bf16 x bf16 -> f32 accumulate on the MXU, then bias + ReLU
    # in f32 on the VPU.  Biases are (1, N) and broadcast over the tile rows.
    h = jnp.dot(x_ref[...], w1_ref[...], preferred_element_type=jnp.float32)
    h = jnp.maximum(h + b1_ref[...], 0.0)
    # Output layer: cast activations back to bf16 for the second MXU pass,
    # accumulate in f32, then bias + tanh (EUP) in f32.
    y = jnp.dot(h.astype(jnp.bfloat16), w2_ref[...],
                preferred_element_type=jnp.float32)
    o_ref[...] = jnp.tanh(y + b2_ref[...]).astype(o_ref.dtype)


@jax.jit
def generator_forward(x, w1, b1, w2, b2):
    """x: [batch, input_size]; w1: [in, 128]; b1: [1, 128];
    w2: [128, out]; b2: [1, out].  Returns [batch, out] f32."""
    batch, in_size = x.shape
    hidden = w1.shape[1]
    out_size = w2.shape[1]

    # ---- Lane-dense output: pad output columns to a multiple of 128. ----
    out_p = _round_up(max(out_size, _LANE), _LANE)
    if out_p != out_size:
        w2 = jnp.pad(w2, ((0, 0), (0, out_p - out_size)))
        b2 = jnp.pad(b2, ((0, 0), (0, out_p - out_size)))

    # ---- Adaptive batch tile: big enough to feed the MXU, small enough not
    #      to burn cycles on padding when the batch is tiny. ----
    tm = min(_MAX_TM, _round_up(batch, _SUBLANE_BF16))
    batch_p = _round_up(batch, tm)
    if batch_p != batch:
        x = jnp.pad(x, ((0, batch_p - batch), (0, 0)))

    # ---- bf16 MXU operands (one-time casts in the wrapper). ----
    xb = x.astype(jnp.bfloat16)
    w1b = w1.astype(jnp.bfloat16)
    w2b = w2.astype(jnp.bfloat16)
    b1f = b1.astype(jnp.float32)
    b2f = b2.astype(jnp.float32)

    grid = (batch_p // tm,)

    flops = 2 * batch_p * (in_size * hidden + hidden * out_p)
    bytes_accessed = (xb.size * 2 + w1b.size * 2 + w2b.size * 2
                      + b1f.size * 4 + b2f.size * 4 + batch_p * out_p * 4)
    cost = pl.CostEstimate(flops=flops,
                           transcendentals=batch_p * out_p,
                           bytes_accessed=bytes_accessed)

    out_padded = pl.pallas_call(
        generator_kernel,
        out_shape=jax.ShapeDtypeStruct((batch_p, out_p), jnp.float32),
        grid=grid,
        in_specs=[
            # Activation stream: one (tm, in) tile per grid step.
            pl.BlockSpec((tm, in_size), lambda i: (i, 0)),
            # Weights / biases: constant block index -> fetched once, resident.
            pl.BlockSpec((in_size, hidden), lambda i: (0, 0)),
            pl.BlockSpec((1, hidden), lambda i: (0, 0)),
            pl.BlockSpec((hidden, out_p), lambda i: (0, 0)),
            pl.BlockSpec((1, out_p), lambda i: (0, 0)),
        ],
        out_specs=pl.BlockSpec((tm, out_p), lambda i: (i, 0)),
        compiler_params=pltpu.CompilerParams(
            dimension_semantics=("parallel",)),
        cost_estimate=cost,
    )(xb, w1b, b1f, w2b, b2f)

    return out_padded[:batch, :out_size]


def init_params(key, input_size, hidden_size, output_size):
    """Deterministic init mimicking torch.nn.Linear default
    (U[-1/sqrt(fan_in), 1/sqrt(fan_in)]); weights stored as [in, out]."""
    k1, k2, k3, k4 = jax.random.split(key, 4)
    bound1 = 1.0 / jnp.sqrt(input_size)
    bound2 = 1.0 / jnp.sqrt(hidden_size)
    w1 = jax.random.uniform(k1, (input_size, hidden_size), jnp.float32, -bound1, bound1)
    b1 = jax.random.uniform(k2, (1, hidden_size), jnp.float32, -bound1, bound1)
    w2 = jax.random.uniform(k3, (hidden_size, output_size), jnp.float32, -bound2, bound2)
    b2 = jax.random.uniform(k4, (1, output_size), jnp.float32, -bound2, bound2)
    return w1, b1, w2, b2


if __name__ == "__main__":
    input_size = 32      # noise / latent dimension
    hidden_size = 128    # fixed by the module
    output_size = 64     # generated sample dimension
    batch = 500          # exercises the batch grid (2 steps) and row padding

    key = jax.random.PRNGKey(0)
    kx, kp = jax.random.split(key)
    x = jax.random.normal(kx, (batch, input_size), jnp.float32)
    w1, b1, w2, b2 = init_params(kp, input_size, hidden_size, output_size)

    out = generator_forward(x, w1, b1, w2, b2)
    out = jax.block_until_ready(out)
    assert out.shape == (batch, output_size)

    # Reference with matching bf16-operand / f32-accumulate math (tight check).
    xb, w1b, w2b = (a.astype(jnp.bfloat16) for a in (x, w1, w2))
    h_ref = jnp.maximum(jnp.dot(xb, w1b, preferred_element_type=jnp.float32) + b1, 0.0)
    ref_bf16 = jnp.tanh(
        jnp.dot(h_ref.astype(jnp.bfloat16), w2b, preferred_element_type=jnp.float32) + b2)
    assert jnp.allclose(out, ref_bf16, atol=1e-3, rtol=1e-3)

    # Full-precision reference (loose check: bf16 MXU inputs, f32 accumulation).
    ref_f32 = jnp.tanh(jnp.maximum(x @ w1 + b1, 0.0) @ w2 + b2)
    assert jnp.allclose(out, ref_f32, atol=5e-2, rtol=5e-2)

    print("KERNEL_OK")
</pallas_src>

<mosaic_0001>
module attributes {stable_mosaic.version = 11 : i64} {
  func.func @generator_kernel(%arg0: i32, %arg1: memref<256x32xbf16, #tpu.memory_space<vmem>>, %arg2: memref<32x128xbf16, #tpu.memory_space<vmem>>, %arg3: memref<1x128xf32, #tpu.memory_space<vmem>>, %arg4: memref<128x128xbf16, #tpu.memory_space<vmem>>, %arg5: memref<1x128xf32, #tpu.memory_space<vmem>>, %arg6: memref<256x128xf32, #tpu.memory_space<vmem>>) attributes {dimension_semantics = [#tpu.dimension_semantics<parallel>], iteration_bounds = array<i64: 2>, scalar_prefetch = 0 : i64, scratch_operands = 0 : i64, tpu.core_type = #tpu.core_type<tc>, window_params = [{transform_indices = @transform_0, window_bounds = array<i64: 256, 32>}, {pipeline_mode = #tpu.pipeline_mode<synchronous>, transform_indices = @transform_1, window_bounds = array<i64: 32, 128>}, {pipeline_mode = #tpu.pipeline_mode<synchronous>, transform_indices = @transform_2, window_bounds = array<i64: 1, 128>}, {pipeline_mode = #tpu.pipeline_mode<synchronous>, transform_indices = @transform_3, window_bounds = array<i64: 128, 128>}, {pipeline_mode = #tpu.pipeline_mode<synchronous>, transform_indices = @transform_4, window_bounds = array<i64: 1, 128>}, {transform_indices = @transform_5, window_bounds = array<i64: 256, 128>}]} {
    %c0 = arith.constant 0 : index
    %c0_0 = arith.constant 0 : index
    %0 = vector.load %arg1[%c0, %c0_0] : memref<256x32xbf16, #tpu.memory_space<vmem>>, vector<256x32xbf16>
    %c0_1 = arith.constant 0 : index
    %c0_2 = arith.constant 0 : index
    %1 = vector.load %arg2[%c0_1, %c0_2] : memref<32x128xbf16, #tpu.memory_space<vmem>>, vector<32x128xbf16>
    %cst = arith.constant dense<0.000000e+00> : vector<256x128xf32>
    %2 = tpu.matmul %0, %1, %cst {dimension_numbers = #tpu.dot_dimension_numbers<[1], [0], [0], [1], [0, 0, 1, 1], [], []>} : vector<256x32xbf16>, vector<32x128xbf16>, vector<256x128xf32> -> vector<256x128xf32>
    %c0_3 = arith.constant 0 : index
    %c0_4 = arith.constant 0 : index
    %3 = vector.load %arg3[%c0_3, %c0_4] : memref<1x128xf32, #tpu.memory_space<vmem>>, vector<1x128xf32>
    %4 = vector.broadcast %3 : vector<1x128xf32> to vector<256x128xf32>
    %5 = arith.addf %2, %4 : vector<256x128xf32>
    %cst_5 = arith.constant 0.000000e+00 : f32
    %6 = vector.broadcast %cst_5 : f32 to vector<256x128xf32>
    %7 = arith.maximumf %5, %6 : vector<256x128xf32>
    %8 = arith.truncf %7 : vector<256x128xf32> to vector<256x128xbf16>
    %c0_6 = arith.constant 0 : index
    %c0_7 = arith.constant 0 : index
    %9 = vector.load %arg4[%c0_6, %c0_7] : memref<128x128xbf16, #tpu.memory_space<vmem>>, vector<128x128xbf16>
    %cst_8 = arith.constant dense<0.000000e+00> : vector<256x128xf32>
    %10 = tpu.matmul %8, %9, %cst_8 {dimension_numbers = #tpu.dot_dimension_numbers<[1], [0], [0], [1], [0, 0, 1, 1], [], []>} : vector<256x128xbf16>, vector<128x128xbf16>, vector<256x128xf32> -> vector<256x128xf32>
    %c0_9 = arith.constant 0 : index
    %c0_10 = arith.constant 0 : index
    %11 = vector.load %arg5[%c0_9, %c0_10] : memref<1x128xf32, #tpu.memory_space<vmem>>, vector<1x128xf32>
    %12 = vector.broadcast %11 : vector<1x128xf32> to vector<256x128xf32>
    %13 = arith.addf %10, %12 : vector<256x128xf32>
    %14 = math.tanh %13 : vector<256x128xf32>
    %c0_11 = arith.constant 0 : index
    %c0_12 = arith.constant 0 : index
    %15 = vector.load %arg6[%c0_11, %c0_12] : memref<256x128xf32, #tpu.memory_space<vmem>>, vector<256x128xf32>
    tpu.vector_store %arg6[%c0_11, %c0_12], %14 {strides = array<i32>} : memref<256x128xf32, #tpu.memory_space<vmem>>, vector<256x128xf32>,
    return
  }
  func.func @transform_0(%arg0: i32) -> (i32, i32) {
    %c0_i32 = arith.constant 0 : i32
    %c0_i32_0 = arith.constant 0 : i32
    return %arg0, %c0_i32 : i32, i32
  }
  func.func @transform_1(%arg0: i32) -> (i32, i32) {
    %c0_i32 = arith.constant 0 : i32
    %c0_i32_0 = arith.constant 0 : i32
    %c0_i32_1 = arith.constant 0 : i32
    return %c0_i32, %c0_i32_0 : i32, i32
  }
  func.func @transform_2(%arg0: i32) -> (i32, i32) {
    %c0_i32 = arith.constant 0 : i32
    %c0_i32_0 = arith.constant 0 : i32
    %c0_i32_1 = arith.constant 0 : i32
    return %c0_i32, %c0_i32_0 : i32, i32
  }
  func.func @transform_3(%arg0: i32) -> (i32, i32) {
    %c0_i32 = arith.constant 0 : i32
    %c0_i32_0 = arith.constant 0 : i32
    %c0_i32_1 = arith.constant 0 : i32
    return %c0_i32, %c0_i32_0 : i32, i32
  }
  func.func @transform_4(%arg0: i32) -> (i32, i32) {
    %c0_i32 = arith.constant 0 : i32
    %c0_i32_0 = arith.constant 0 : i32
    %c0_i32_1 = arith.constant 0 : i32
    return %c0_i32, %c0_i32_0 : i32, i32
  }
  func.func @transform_5(%arg0: i32) -> (i32, i32) {
    %c0_i32 = arith.constant 0 : i32
    %c0_i32_0 = arith.constant 0 : i32
    return %arg0, %c0_i32 : i32, i32
  }
}

</mosaic_0001>

<bundles_post_ra>
// kernel: generator_forward.1
= control target key start
LH: loop header
LB: loop body
LE: loop exit
PB: predicated region body
PF: predicated region fallthrough
CT: control target
= control target key end

     0   :  { %s1307_s18 = smov 0   ;;  %s1500_s0 = inlined_call_operand.vmem [shape: bf16[512,32], index: 0, kind: input, shape index: {}]   ;;  %s1501_s1 = inlined_call_operand.vmem [shape: bf16[32,128], index: 1, kind: input, shape index: {}]   ;;  %s1502_s2 = inlined_call_operand.vmem [shape: f32[1,128], index: 2, kind: input, shape index: {}]   ;;  %s1503_s3 = inlined_call_operand.vmem [shape: bf16[128,128], index: 3, kind: input, shape index: {}]   ;;  %s1504_s4 = inlined_call_operand.vmem [shape: f32[1,128], index: 4, kind: input, shape index: {}]   ;;  %s1505_s5 = inlined_call_operand.vmem [shape: f32[512,128], index: 5, kind: output, shape index: {}]  }
   0x1 LB: > { %s974_s19 = sadd.s32 4294967295, %s1275_s18   ;;  %p978_p0 = scmp.ge.s32.totalorder %s1275_s18, 1  ;;  %s1275_s18 = sphi %s1307_s18, %s15_s18  }
   0x2   : > { %p188_p1 = scmp.lt.s32.totalorder %s1275_s18, 3 }
   0x4   : > { %p189_p2 = pnand %p978_p0, %p188_p1 }
   0x5   : > { %s979_s22 = sshll.u32 (!%p189_p2), %s974_s19, 5 }
   0x6   : > { %192 = sbr.rel (%p189_p2) target bundleno = 498 (0x1f2), region = 40  ;;  %p217_p3 = scmp.lt.s32.totalorder (!%p189_p2), %s979_s22, 63 }
   0xb   : > { %v1179_v0 = vld [vmem:[%s1501_s1 + $0x8] sm:$0xff]   ;;  %v1180_v1 = vld [vmem:[%s1501_s1] sm:$0xff]   ;;  %v1197_v2 = vld [vmem:[%s1503_s3 + $0x38] sm:$0xff]   ;;  %s1507_s22 = smov (!%p217_p3, %s979_s22), 63  ;;  %vm364_vm0 = vcmask 261120  }
   0xc   : > { %1071 = vmatprep.subr.bf16.mxu0 %v1179_v0  ;;  %v1198_v3 = vld [vmem:[%s1503_s3 + $0x30] sm:$0xff]   ;;  %1155 = vmatprep.subr.bf16.mxu1 %v1197_v2  ;;  %s980_s29 = sshll.u32 %s1507_s22, 2  ;;  %v1199_v4 = vld [vmem:[%s1503_s3 + $0x28] sm:$0xff]   ;;  %v1200_v8 = vld [vmem:[%s1503_s3 + $0x20] sm:$0xff]   ;;  %s982_s26 = sshll.u32 %s1507_s22, 3 }
   0xd   : > { %1072 = vmatpush3.bf16.msra.mxu0 %v1179_v0  ;;  %1163 = vmatpush3.bf16.msra.mxu1 %v1197_v2  ;;  %s1333_s7 = scalar_lea.vmem %s1500_s0, %s980_s29  ;;  %v1201_v13 = vld [vmem:[%s1503_s3 + $0x18] sm:$0xff]   ;;  %v1202_v23 = vld [vmem:[%s1503_s3 + $0x10] sm:$0xff]   ;;  %v1203_v24 = vld [vmem:[%s1503_s3 + $0x8] sm:$0xff]   ;;  %s1438_s29 = scalar_lea.vmem %s1505_s5, %s982_s26 }
   0xe   : > { %1073 = vmatprep.subr.bf16.mxu0 %v1180_v1  ;;  %1156 = vmatprep.subr.bf16.mxu1 %v1198_v3  ;;  %v1181_v5 = vld [vmem:[%s1333_s7] sm:$0xff]   ;;  %v1182_v6 = vld [vmem:[%s1333_s7 + $0x8] sm:$0xff]   ;;  %v1183_v7 = vld [vmem:[%s1333_s7 + $0x10] sm:$0xff]  }
   0xf   : > { %1075 = vmatprep.mubr.msk.bf16.mxu0 %vm364_vm0, %v1181_v5  ;;  %v1184_v9 = vld [vmem:[%s1333_s7 + $0x18] sm:$0xff]   ;;  %v1185_v10 = vld [vmem:[%s1333_s7 + $0x20] sm:$0xff]   ;;  %v1186_v11 = vld [vmem:[%s1333_s7 + $0x28] sm:$0xff]  }
  0x10   : > { %v1187_v12 = vld [vmem:[%s1333_s7 + $0x30] sm:$0xff]   ;;  %v1188_v14 = vld [vmem:[%s1333_s7 + $0x38] sm:$0xff]   ;;  %v1189_v15 = vld [vmem:[%s1333_s7 + $0x40] sm:$0xff]  }
  0x11   : > { %1074 = vmatpush3.bf16.msra.mxu0 %v1180_v1  ;;  %1164 = vmatpush3.bf16.msra.mxu1 %v1198_v3  ;;  %v1190_v16 = vld [vmem:[%s1333_s7 + $0x48] sm:$0xff]   ;;  %v1191_v17 = vld [vmem:[%s1333_s7 + $0x50] sm:$0xff]   ;;  %v1192_v18 = vld [vmem:[%s1333_s7 + $0x58] sm:$0xff]  }
  0x12   : > { %1107 = vmatprep.subr.bf16.mxu0 %v1197_v2  ;;  %1157 = vmatprep.subr.bf16.mxu1 %v1199_v4  ;;  %v1193_v19 = vld [vmem:[%s1333_s7 + $0x60] sm:$0xff]   ;;  %v1194_v20 = vld [vmem:[%s1333_s7 + $0x68] sm:$0xff]   ;;  %v1195_v21 = vld [vmem:[%s1333_s7 + $0x70] sm:$0xff]  }
  0x13   : > { %v1196_v22 = vld [vmem:[%s1333_s7 + $0x78] sm:$0xff]   ;;  %v1204_v25 = vld [vmem:[%s1503_s3] sm:$0xff]  }
  0x14   : > { %1076 = vmatmul.mubr.msk.bf16.vlgmr.msra.gmra.mxu0 %vm364_vm0, %v1182_v6  ;;  %v1388_v28 = vld [vmem:[%s1502_s2] ss:$0 sm:$0xff] }
  0x15   : > { %1079 = vmatprep.mubr.msk.bf16.mxu0 %vm364_vm0, %v1183_v7  ;;  %1108 = vmatpush3.bf16.msra.mxu0 %v1197_v2 }
  0x16   : > { %1109 = vmatprep.subr.bf16.mxu0 %v1198_v3  ;;  %1165 = vmatpush3.bf16.msra.mxu1 %v1199_v4 }
  0x17   : > { %1158 = vmatprep.subr.bf16.mxu1 %v1200_v8 }
  0x19   : > { %1110 = vmatpush3.bf16.msra.mxu0 %v1198_v3 }
  0x1a   : > { %1111 = vmatprep.subr.bf16.mxu0 %v1199_v4  ;;  %1166 = vmatpush3.bf16.msra.mxu1 %v1200_v8 }
  0x1b   : > { %1159 = vmatprep.subr.bf16.mxu1 %v1201_v13 }
  0x1c   : > { %1080 = vmatmul.mubr.msk.bf16.gmra.mxu0 %vm364_vm0, %v1184_v9 }
  0x1d   : > { %1083 = vmatprep.mubr.msk.bf16.mxu0 %vm364_vm0, %v1185_v10  ;;  %1112 = vmatpush3.bf16.msra.mxu0 %v1199_v4 }
  0x1e   : > { %1113 = vmatprep.subr.bf16.mxu0 %v1200_v8  ;;  %1167 = vmatpush3.bf16.msra.mxu1 %v1201_v13 }
  0x1f   : > { %1160 = vmatprep.subr.bf16.mxu1 %v1202_v23 }
  0x21   : > { %1114 = vmatpush3.bf16.msra.mxu0 %v1200_v8 }
  0x22   : > { %1115 = vmatprep.subr.bf16.mxu0 %v1201_v13  ;;  %1168 = vmatpush3.bf16.msra.mxu1 %v1202_v23 }
  0x23   : > { %1161 = vmatprep.subr.bf16.mxu1 %v1203_v24 }
  0x24   : > { %1084 = vmatmul.mubr.msk.bf16.gmra.mxu0 %vm364_vm0, %v1186_v11 }
  0x25   : > { %1087 = vmatprep.mubr.msk.bf16.mxu0 %vm364_vm0, %v1187_v12  ;;  %1116 = vmatpush3.bf16.msra.mxu0 %v1201_v13 }
  0x26   : > { %1117 = vmatprep.subr.bf16.mxu0 %v1202_v23  ;;  %1169 = vmatpush3.bf16.msra.mxu1 %v1203_v24 }
  0x27   : > { %1162 = vmatprep.subr.bf16.mxu1 %v1204_v25 }
  0x29   : > { %1118 = vmatpush3.bf16.msra.mxu0 %v1202_v23 }
  0x2a   : > { %1119 = vmatprep.subr.bf16.mxu0 %v1203_v24  ;;  %1170 = vmatpush3.bf16.msra.mxu1 %v1204_v25 }
  0x2c   : > { %1088 = vmatmul.mubr.msk.bf16.gmra.mxu0 %vm364_vm0, %v1188_v14 }
  0x2d   : > { %1091 = vmatprep.mubr.msk.bf16.mxu0 %vm364_vm0, %v1189_v15  ;;  %1120 = vmatpush3.bf16.msra.mxu0 %v1203_v24 }
  0x2e   : > { %1121 = vmatprep.subr.bf16.mxu0 %v1204_v25 }
  0x31   : > { %1122 = vmatpush3.bf16.msra.mxu0 %v1204_v25 }
  0x34   : > { %1092 = vmatmul.mubr.msk.bf16.gmra.mxu0 %vm364_vm0, %v1190_v16 }
  0x35   : > { %1095 = vmatprep.mubr.msk.bf16.mxu0 %vm364_vm0, %v1191_v17 }
  0x3c   : > { %1096 = vmatmul.mubr.msk.bf16.gmra.mxu0 %vm364_vm0, %v1192_v18 }
  0x3d   : > { %1099 = vmatprep.mubr.msk.bf16.mxu0 %vm364_vm0, %v1193_v19 }
  0x44   : > { %1100 = vmatmul.mubr.msk.bf16.gmra.mxu0 %vm364_vm0, %v1194_v20 }
  0x45   : > { %1103 = vmatprep.mubr.msk.bf16.mxu0 %vm364_vm0, %v1195_v21 }
  0x4c   : > { %1104 = vmatmul.mubr.msk.bf16.gmra.mxu0 %vm364_vm0, %v1196_v22 }
  0xd4   : > { %v1077_v26 = vpop.f32.mrf.mxu0 }
  0xd5   : > { %v456_v32 = vadd.f32 %v1077_v26, %v1388_v28 }
  0xd6   : > { %v447_v27 = vpop.f32.mrf.mxu0 }
  0xd7   : > { %v448_v30 = vadd.f32 %v1388_v28, %v447_v27  ;;  %v576_v39 = vmax.f32 %v456_v32, 0.0 }
  0xd8   : > { %v1078_v29 = vpop.f32.mrf.mxu0 }
  0xd9   : > { %v459_v31 = vadd.f32 %v1078_v29, %v1388_v28  ;;  %v574_v37 = vmax.f32 %v448_v30, 0.0 }
  0xda   : > { %v450_v33 = vpop.f32.mrf.mxu0 }
  0xdb   : > { %v451_v34 = vadd.f32 %v1388_v28, %v450_v33  ;;  %v577_v35 = vmax.f32 %v459_v31, 0.0 }
  0xdc   : > { %v1081_v36 = vpop.f32.mrf.mxu0 }
  0xdd   : > { %v575_v38 = vmax.f32 %v451_v34, 0.0  ;;  %v607_v42 = vpack.c.bf16 %v577_v35, %v576_v39  ;;  %v472_v46 = vadd.f32 %v1081_v36, %v1388_v28 }
  0xde   : > { %v463_v40 = vpop.f32.mrf.mxu0 }
  0xdf   : > { %v606_v41 = vpack.c.bf16 %v575_v38, %v574_v37  ;;  %v464_v44 = vadd.f32 %v1388_v28, %v463_v40  ;;  %v580_v53 = vmax.f32 %v472_v46, 0.0 }
  0xe0   : > { %v1082_v43 = vpop.f32.mrf.mxu0 }
  0xe1   : > { %v475_v45 = vadd.f32 %v1082_v43, %v1388_v28  ;;  %1123 = vmatprep.mubr.bf16.mxu0 %v606_v41  ;;  %v578_v51 = vmax.f32 %v464_v44, 0.0 }
  0xe2   : > { %v466_v47 = vpop.f32.mrf.mxu0  ;;  %1124 = vmatmul.mubr.bf16.vlgmr.msra.gmra.mxu0 %v607_v42 }
  0xe3   : > { %v467_v48 = vadd.f32 %v1388_v28, %v466_v47  ;;  %v581_v49 = vmax.f32 %v475_v45, 0.0 }
  0xe4   : > { %v1085_v50 = vpop.f32.mrf.mxu0 }
  0xe5   : > { %v579_v52 = vmax.f32 %v467_v48, 0.0  ;;  %v609_v56 = vpack.c.bf16 %v581_v49, %v580_v53  ;;  %v488_v60 = vadd.f32 %v1085_v50, %v1388_v28 }
  0xe6   : > { %v479_v54 = vpop.f32.mrf.mxu0 }
  0xe7   : > { %v608_v55 = vpack.c.bf16 %v579_v52, %v578_v51  ;;  %v480_v58 = vadd.f32 %v1388_v28, %v479_v54  ;;  %v584_v3 = vmax.f32 %v488_v60, 0.0 }
  0xe8   : > { %v1086_v57 = vpop.f32.mrf.mxu0 }
  0xe9   : > { %v491_v59 = vadd.f32 %v1086_v57, %v1388_v28  ;;  %1127 = vmatprep.mubr.bf16.mxu1 %v608_v55  ;;  %v582_v1 = vmax.f32 %v480_v58, 0.0 }
  0xea   : > { %v482_v61 = vpop.f32.mrf.mxu0  ;;  %1128 = vmatmul.mubr.bf16.vlgmr.msra.gmra.mxu1 %v609_v56 }
  0xeb   : > { %v483_v62 = vadd.f32 %v1388_v28, %v482_v61  ;;  %v585_v63 = vmax.f32 %v491_v59, 0.0 }
  0xec   : > { %v1089_v0 = vpop.f32.mrf.mxu0 }
  0xed   : > { %v583_v2 = vmax.f32 %v483_v62, 0.0  ;;  %v611_v6 = vpack.c.bf16 %v585_v63, %v584_v3  ;;  %v504_v10 = vadd.f32 %v1089_v0, %v1388_v28 }
  0xee   : > { %v495_v4 = vpop.f32.mrf.mxu0 }
  0xef   : > { %v610_v5 = vpack.c.bf16 %v583_v2, %v582_v1  ;;  %v496_v8 = vadd.f32 %v1388_v28, %v495_v4  ;;  %v588_v17 = vmax.f32 %v504_v10, 0.0 }
  0xf0   : > { %v1090_v7 = vpop.f32.mrf.mxu0 }
  0xf1   : > { %v507_v9 = vadd.f32 %v1090_v7, %v1388_v28  ;;  %1131 = vmatprep.mubr.bf16.mxu1 %v610_v5  ;;  %v586_v15 = vmax.f32 %v496_v8, 0.0 }
  0xf2   : > { %v498_v11 = vpop.f32.mrf.mxu0  ;;  %1132 = vmatmul.mubr.bf16.gmra.mxu1 %v611_v6 }
  0xf3   : > { %v499_v12 = vadd.f32 %v1388_v28, %v498_v11  ;;  %v589_v13 = vmax.f32 %v507_v9, 0.0 }
  0xf4   : > { %v1093_v14 = vpop.f32.mrf.mxu0 }
  0xf5   : > { %v587_v16 = vmax.f32 %v499_v12, 0.0  ;;  %v613_v20 = vpack.c.bf16 %v589_v13, %v588_v17  ;;  %v520_v24 = vadd.f32 %v1093_v14, %v1388_v28  ;;  %v1425_v12 = vld [vmem:[%s1504_s4] ss:$0 sm:$0xff] }
  0xf6   : > { %v511_v18 = vpop.f32.mrf.mxu0 }
  0xf7   : > { %v612_v19 = vpack.c.bf16 %v587_v16, %v586_v15  ;;  %v512_v22 = vadd.f32 %v1388_v28, %v511_v18  ;;  %v592_v32 = vmax.f32 %v520_v24, 0.0 }
  0xf8   : > { %v1094_v21 = vpop.f32.mrf.mxu0 }
  0xf9   : > { %v523_v23 = vadd.f32 %v1094_v21, %v1388_v28  ;;  %1135 = vmatprep.mubr.bf16.mxu1 %v612_v19  ;;  %v590_v30 = vmax.f32 %v512_v22, 0.0 }
  0xfa   : > { %v514_v25 = vpop.f32.mrf.mxu0  ;;  %1136 = vmatmul.mubr.bf16.gmra.mxu1 %v613_v20 }
  0xfb   : > { %v515_v26 = vadd.f32 %v1388_v28, %v514_v25  ;;  %v593_v27 = vmax.f32 %v523_v23, 0.0 }
  0xfc   : > { %v1097_v29 = vpop.f32.mrf.mxu0 }
  0xfd   : > { %v591_v31 = vmax.f32 %v515_v26, 0.0  ;;  %v615_v35 = vpack.c.bf16 %v593_v27, %v592_v32  ;;  %v536_v39 = vadd.f32 %v1097_v29, %v1388_v28 }
  0xfe   : > { %v527_v33 = vpop.f32.mrf.mxu0 }
  0xff   : > { %v614_v34 = vpack.c.bf16 %v591_v31, %v590_v30  ;;  %v528_v37 = vadd.f32 %v1388_v28, %v527_v33  ;;  %v596_v46 = vmax.f32 %v536_v39, 0.0 }
 0x100   : > { %v1098_v36 = vpop.f32.mrf.mxu0 }
 0x101   : > { %v539_v38 = vadd.f32 %v1098_v36, %v1388_v28  ;;  %1139 = vmatprep.mubr.bf16.mxu1 %v614_v34  ;;  %v594_v44 = vmax.f32 %v528_v37, 0.0 }
 0x102   : > { %v530_v40 = vpop.f32.mrf.mxu0  ;;  %1140 = vmatmul.mubr.bf16.gmra.mxu1 %v615_v35 }
 0x103   : > { %v531_v41 = vadd.f32 %v1388_v28, %v530_v40  ;;  %v597_v42 = vmax.f32 %v539_v38, 0.0 }
 0x104   : > { %v1101_v43 = vpop.f32.mrf.mxu0 }
 0x105   : > { %v595_v45 = vmax.f32 %v531_v41, 0.0  ;;  %v617_v49 = vpack.c.bf16 %v597_v42, %v596_v46  ;;  %v552_v53 = vadd.f32 %v1101_v43, %v1388_v28 }
 0x106   : > { %v543_v47 = vpop.f32.mrf.mxu0 }
 0x107   : > { %v616_v48 = vpack.c.bf16 %v595_v45, %v594_v44  ;;  %v544_v51 = vadd.f32 %v1388_v28, %v543_v47  ;;  %v600_v60 = vmax.f32 %v552_v53, 0.0 }
 0x108   : > { %v1102_v50 = vpop.f32.mrf.mxu0 }
 0x109   : > { %v555_v52 = vadd.f32 %v1102_v50, %v1388_v28  ;;  %1143 = vmatprep.mubr.bf16.mxu1 %v616_v48  ;;  %v598_v58 = vmax.f32 %v544_v51, 0.0 }
 0x10a   : > { %v546_v54 = vpop.f32.mrf.mxu0  ;;  %1144 = vmatmul.mubr.bf16.gmra.mxu1 %v617_v49 }
 0x10b   : > { %v547_v55 = vadd.f32 %v1388_v28, %v546_v54  ;;  %v601_v56 = vmax.f32 %v555_v52, 0.0 }
 0x10c   : > { %v1105_v57 = vpop.f32.mrf.mxu0 }
 0x10d   : > { %v599_v59 = vmax.f32 %v547_v55, 0.0  ;;  %v619_v63 = vpack.c.bf16 %v601_v56, %v600_v60  ;;  %v568_v3 = vadd.f32 %v1105_v57, %v1388_v28 }
 0x10e   : > { %v559_v61 = vpop.f32.mrf.mxu0 }
 0x10f   : > { %v618_v62 = vpack.c.bf16 %v599_v59, %v598_v58  ;;  %v560_v1 = vadd.f32 %v1388_v28, %v559_v61  ;;  %v604_v9 = vmax.f32 %v568_v3, 0.0 }
 0x110   : > { %v1106_v0 = vpop.f32.mrf.mxu0 }
 0x111   : > { %v571_v2 = vadd.f32 %v1106_v0, %v1388_v28  ;;  %1147 = vmatprep.mubr.bf16.mxu1 %v618_v62  ;;  %v602_v7 = vmax.f32 %v560_v1, 0.0 }
 0x112   : > { %v562_v4 = vpop.f32.mrf.mxu0  ;;  %1148 = vmatmul.mubr.bf16.gmra.mxu1 %v619_v63 }
 0x113   : > { %v563_v5 = vadd.f32 %v1388_v28, %v562_v4  ;;  %v605_v6 = vmax.f32 %v571_v2, 0.0 }
 0x115   : > { %v603_v8 = vmax.f32 %v563_v5, 0.0  ;;  %v621_v11 = vpack.c.bf16 %v605_v6, %v604_v9 }
 0x117   : > { %v620_v10 = vpack.c.bf16 %v603_v8, %v602_v7 }
 0x119   : > { %1151 = vmatprep.mubr.bf16.mxu1 %v620_v10 }
 0x11a   : > { %1152 = vmatmul.mubr.bf16.gmra.mxu1 %v621_v11 }
 0x1a2   : > { %v1125_v13 = vpop.f32.mrf.mxu0 }
 0x1a3   : > { %v736_v14 = vadd.f32 %v1125_v13, %v1425_v12 }
 0x1a4   : > { %v727_v15 = vpop.f32.mrf.mxu0 }
 0x1a5   : > { %1205 = vtanh.f32 %v736_v14  ;;  %v728_v28 = vadd.f32 %v1425_v12, %v727_v15 }
 0x1a6   : > { %v1126_v16 = vpop.f32.mrf.mxu0 }
 0x1a7   : > { %1207 = vtanh.f32 %v728_v28  ;;  %v739_v17 = vadd.f32 %v1126_v16, %v1425_v12 }
 0x1a8   : > { %v730_v18 = vpop.f32.mrf.mxu0 }
 0x1a9   : > { %1209 = vtanh.f32 %v739_v17  ;;  %v731_v19 = vadd.f32 %v1425_v12, %v730_v18 }
 0x1aa   : > { %v1129_v20 = vpop.f32.mrf.mxu1 }
 0x1ab   : > { %1211 = vtanh.f32 %v731_v19  ;;  %v752_v21 = vadd.f32 %v1129_v20, %v1425_v12 }
 0x1ac   : > { %v743_v22 = vpop.f32.mrf.mxu1 }
 0x1ad   : > { %1213 = vtanh.f32 %v752_v21  ;;  %v744_v23 = vadd.f32 %v1425_v12, %v743_v22 }
 0x1ae   : > { %v1130_v24 = vpop.f32.mrf.mxu1 }
 0x1af   : > { %1215 = vtanh.f32 %v744_v23  ;;  %v755_v25 = vadd.f32 %v1130_v24, %v1425_v12 }
 0x1b0   : > { %v746_v26 = vpop.f32.mrf.mxu1 }
 0x1b1   : > { %1217 = vtanh.f32 %v755_v25  ;;  %v747_v27 = vadd.f32 %v1425_v12, %v746_v26 }
 0x1b2   : > { %v1206_v29 = vpop.eup %1205  ;;  %v1133_v30 = vpop.f32.mrf.mxu1 }
 0x1b3   : > { %888 = vst [vmem:[%s1438_s29 + $0x10] sm:$0xff] %v1206_v29  ;;  %1219 = vtanh.f32 %v747_v27  ;;  %v768_v31 = vadd.f32 %v1133_v30, %v1425_v12 }
 0x1b4   : > { %v1208_v32 = vpop.eup %1207  ;;  %v759_v33 = vpop.f32.mrf.mxu1 }
 0x1b5   : > { %886 = vst [vmem:[%s1438_s29] sm:$0xff] %v1208_v32  ;;  %1221 = vtanh.f32 %v768_v31  ;;  %v760_v34 = vadd.f32 %v1425_v12, %v759_v33 }
 0x1b6   : > { %v1210_v35 = vpop.eup %1209  ;;  %v1134_v36 = vpop.f32.mrf.mxu1 }
 0x1b7   : > { %889 = vst [vmem:[%s1438_s29 + $0x18] sm:$0xff] %v1210_v35  ;;  %1223 = vtanh.f32 %v760_v34  ;;  %v771_v37 = vadd.f32 %v1134_v36, %v1425_v12 }
 0x1b8   : > { %v1212_v38 = vpop.eup %1211  ;;  %v762_v39 = vpop.f32.mrf.mxu1 }
 0x1b9   : > { %887 = vst [vmem:[%s1438_s29 + $0x8] sm:$0xff] %v1212_v38  ;;  %1225 = vtanh.f32 %v771_v37  ;;  %v763_v40 = vadd.f32 %v1425_v12, %v762_v39 }
 0x1ba   : > { %v1214_v41 = vpop.eup %1213  ;;  %v1137_v42 = vpop.f32.mrf.mxu1 }
 0x1bb   : > { %892 = vst [vmem:[%s1438_s29 + $0x30] sm:$0xff] %v1214_v41  ;;  %1227 = vtanh.f32 %v763_v40  ;;  %v784_v43 = vadd.f32 %v1137_v42, %v1425_v12 }
 0x1bc   : > { %v1216_v44 = vpop.eup %1215  ;;  %v775_v45 = vpop.f32.mrf.mxu1 }
 0x1bd   : > { %890 = vst [vmem:[%s1438_s29 + $0x20] sm:$0xff] %v1216_v44  ;;  %1229 = vtanh.f32 %v784_v43  ;;  %v776_v46 = vadd.f32 %v1425_v12, %v775_v45 }
 0x1be   : > { %v1218_v47 = vpop.eup %1217  ;;  %v1138_v48 = vpop.f32.mrf.mxu1 }
 0x1bf   : > { %893 = vst [vmem:[%s1438_s29 + $0x38] sm:$0xff] %v1218_v47  ;;  %1231 = vtanh.f32 %v776_v46  ;;  %v787_v49 = vadd.f32 %v1138_v48, %v1425_v12 }
 0x1c0   : > { %v1220_v50 = vpop.eup %1219  ;;  %v778_v51 = vpop.f32.mrf.mxu1 }
 0x1c1   : > { %891 = vst [vmem:[%s1438_s29 + $0x28] sm:$0xff] %v1220_v50  ;;  %1233 = vtanh.f32 %v787_v49  ;;  %v779_v52 = vadd.f32 %v1425_v12, %v778_v51 }
 0x1c2   : > { %v1222_v53 = vpop.eup %1221  ;;  %v1141_v54 = vpop.f32.mrf.mxu1 }
 0x1c3   : > { %896 = vst [vmem:[%s1438_s29 + $0x50] sm:$0xff] %v1222_v53  ;;  %1235 = vtanh.f32 %v779_v52  ;;  %v800_v55 = vadd.f32 %v1141_v54, %v1425_v12 }
 0x1c4   : > { %v1224_v56 = vpop.eup %1223  ;;  %v791_v57 = vpop.f32.mrf.mxu1 }
 0x1c5   : > { %894 = vst [vmem:[%s1438_s29 + $0x40] sm:$0xff] %v1224_v56  ;;  %1237 = vtanh.f32 %v800_v55  ;;  %v792_v58 = vadd.f32 %v1425_v12, %v791_v57 }
 0x1c6   : > { %v1226_v59 = vpop.eup %1225  ;;  %v1142_v60 = vpop.f32.mrf.mxu1 }
 0x1c7   : > { %897 = vst [vmem:[%s1438_s29 + $0x58] sm:$0xff] %v1226_v59  ;;  %1239 = vtanh.f32 %v792_v58  ;;  %v803_v61 = vadd.f32 %v1142_v60, %v1425_v12 }
 0x1c8   : > { %v1228_v62 = vpop.eup %1227  ;;  %v794_v63 = vpop.f32.mrf.mxu1 }
 0x1c9   : > { %895 = vst [vmem:[%s1438_s29 + $0x48] sm:$0xff] %v1228_v62  ;;  %1241 = vtanh.f32 %v803_v61  ;;  %v795_v0 = vadd.f32 %v1425_v12, %v794_v63 }
 0x1ca   : > { %v1230_v1 = vpop.eup %1229  ;;  %v1145_v2 = vpop.f32.mrf.mxu1 }
 0x1cb   : > { %900 = vst [vmem:[%s1438_s29 + $0x70] sm:$0xff] %v1230_v1  ;;  %1243 = vtanh.f32 %v795_v0  ;;  %v816_v3 = vadd.f32 %v1145_v2, %v1425_v12 }
 0x1cc   : > { %v1232_v4 = vpop.eup %1231  ;;  %v807_v5 = vpop.f32.mrf.mxu1 }
 0x1cd   : > { %898 = vst [vmem:[%s1438_s29 + $0x60] sm:$0xff] %v1232_v4  ;;  %1245 = vtanh.f32 %v816_v3  ;;  %v808_v6 = vadd.f32 %v1425_v12, %v807_v5 }
 0x1ce   : > { %v1234_v7 = vpop.eup %1233  ;;  %v1146_v8 = vpop.f32.mrf.mxu1 }
 0x1cf   : > { %901 = vst [vmem:[%s1438_s29 + $0x78] sm:$0xff] %v1234_v7  ;;  %1247 = vtanh.f32 %v808_v6  ;;  %v819_v9 = vadd.f32 %v1146_v8, %v1425_v12 }
 0x1d0   : > { %v1236_v10 = vpop.eup %1235  ;;  %v810_v11 = vpop.f32.mrf.mxu1 }
 0x1d1   : > { %899 = vst [vmem:[%s1438_s29 + $0x68] sm:$0xff] %v1236_v10  ;;  %1249 = vtanh.f32 %v819_v9  ;;  %v811_v13 = vadd.f32 %v1425_v12, %v810_v11 }
 0x1d2   : > { %v1238_v14 = vpop.eup %1237  ;;  %v1149_v15 = vpop.f32.mrf.mxu1 }
 0x1d3   : > { %904 = vst [vmem:[%s1438_s29 + $0x90] sm:$0xff] %v1238_v14  ;;  %1251 = vtanh.f32 %v811_v13  ;;  %v832_v28 = vadd.f32 %v1149_v15, %v1425_v12 }
 0x1d4   : > { %v1240_v16 = vpop.eup %1239  ;;  %v823_v17 = vpop.f32.mrf.mxu1 }
 0x1d5   : > { %902 = vst [vmem:[%s1438_s29 + $0x80] sm:$0xff] %v1240_v16  ;;  %1253 = vtanh.f32 %v832_v28  ;;  %v824_v18 = vadd.f32 %v1425_v12, %v823_v17 }
 0x1d6   : > { %v1242_v19 = vpop.eup %1241  ;;  %v1150_v20 = vpop.f32.mrf.mxu1 }
 0x1d7   : > { %905 = vst [vmem:[%s1438_s29 + $0x98] sm:$0xff] %v1242_v19  ;;  %1255 = vtanh.f32 %v824_v18  ;;  %v835_v21 = vadd.f32 %v1150_v20, %v1425_v12 }
 0x1d8   : > { %v1244_v22 = vpop.eup %1243  ;;  %v826_v23 = vpop.f32.mrf.mxu1 }
 0x1d9   : > { %903 = vst [vmem:[%s1438_s29 + $0x88] sm:$0xff] %v1244_v22  ;;  %1257 = vtanh.f32 %v835_v21  ;;  %v827_v24 = vadd.f32 %v1425_v12, %v826_v23 }
 0x1da   : > { %v1246_v25 = vpop.eup %1245  ;;  %v1153_v26 = vpop.f32.mrf.mxu1 }
 0x1db   : > { %908 = vst [vmem:[%s1438_s29 + $0xb0] sm:$0xff] %v1246_v25  ;;  %1259 = vtanh.f32 %v827_v24  ;;  %v848_v27 = vadd.f32 %v1153_v26, %v1425_v12 }
 0x1dc   : > { %v1248_v29 = vpop.eup %1247  ;;  %v839_v30 = vpop.f32.mrf.mxu1 }
 0x1dd   : > { %906 = vst [vmem:[%s1438_s29 + $0xa0] sm:$0xff] %v1248_v29  ;;  %1261 = vtanh.f32 %v848_v27  ;;  %v840_v31 = vadd.f32 %v1425_v12, %v839_v30 }
 0x1de   : > { %v1250_v32 = vpop.eup %1249  ;;  %v1154_v33 = vpop.f32.mrf.mxu1 }
 0x1df   : > { %909 = vst [vmem:[%s1438_s29 + $0xb8] sm:$0xff] %v1250_v32  ;;  %1263 = vtanh.f32 %v840_v31  ;;  %v851_v34 = vadd.f32 %v1154_v33, %v1425_v12 }
 0x1e0   : > { %v1252_v35 = vpop.eup %1251  ;;  %v842_v36 = vpop.f32.mrf.mxu1 }
 0x1e1   : > { %907 = vst [vmem:[%s1438_s29 + $0xa8] sm:$0xff] %v1252_v35  ;;  %1265 = vtanh.f32 %v851_v34  ;;  %v843_v37 = vadd.f32 %v1425_v12, %v842_v36 }
 0x1e2   : > { %v1254_v38 = vpop.eup %1253 }
 0x1e3   : > { %912 = vst [vmem:[%s1438_s29 + $0xd0] sm:$0xff] %v1254_v38  ;;  %1267 = vtanh.f32 %v843_v37 }
 0x1e4   : > { %v1256_v39 = vpop.eup %1255 }
 0x1e5   : > { %910 = vst [vmem:[%s1438_s29 + $0xc0] sm:$0xff] %v1256_v39 }
 0x1e6   : > { %v1258_v40 = vpop.eup %1257 }
 0x1e7   : > { %913 = vst [vmem:[%s1438_s29 + $0xd8] sm:$0xff] %v1258_v40 }
 0x1e8   : > { %v1260_v41 = vpop.eup %1259 }
 0x1e9   : > { %911 = vst [vmem:[%s1438_s29 + $0xc8] sm:$0xff] %v1260_v41 }
 0x1ea   : > { %v1262_v42 = vpop.eup %1261 }
 0x1eb   : > { %916 = vst [vmem:[%s1438_s29 + $0xf0] sm:$0xff] %v1262_v42 }
 0x1ec   : > { %v1264_v43 = vpop.eup %1263 }
 0x1ed   : > { %914 = vst [vmem:[%s1438_s29 + $0xe0] sm:$0xff] %v1264_v43 }
 0x1ee   : > { %v1266_v44 = vpop.eup %1265 }
 0x1ef   : > { %917 = vst [vmem:[%s1438_s29 + $0xf8] sm:$0xff] %v1266_v44 }
 0x1f0   : > { %v1268_v45 = vpop.eup %1267 }
 0x1f1   : > { %915 = vst [vmem:[%s1438_s29 + $0xe8] sm:$0xff] %v1268_v45 }
 0x1f2 PF: > { %s15_s18 = sadd.s32 1, %s1275_s18  }
 0x1f3   : > { %p12_p4 = scmp.ge.s32.totalorder %s15_s18, 4  }
 0x1f5   :  { %14 = sbr.rel (!%p12_p4) target bundleno = 1 (0x1), region = 70 }

</bundles_post_ra>
